<compile_context>
chip_gen: v7x
topology: tpu7x:2x2x1
jax: 0.10.0
libtpu: 0.0.40
codegen_flags: <defaults>
</compile_context>

<pallas_src>
import math
import functools

import jax
import jax.numpy as jnp
from jax.experimental import pallas as pl
from jax.experimental.pallas import tpu as pltpu


def _pick_tile(m, candidates=(512, 256, 128, 64, 32, 16, 8)):
    # Prefer 256/512-row tiles (v6e MXU-friendly), fall back for small problems.
    for t in candidates:
        if m % t == 0:
            return t
    return m


# -------------------- Stage 1: fused Q/K/V projections ----------------------

def qkv_proj_kernel(qx_ref, kx_ref, vx_ref,
                    wq_ref, wk_ref, wv_ref,
                    bq_ref, bk_ref, bv_ref,
                    qo_ref, ko_ref, vo_ref):
    # One M-tile per grid step; all three projections in a single call so the
    # activation tiles stream through one pipeline and launch overhead is paid
    # once.  bf16 MXU operands, fp32 accumulation, fp32 bias add.
    qx = qx_ref[...].astype(jnp.bfloat16)
    kx = kx_ref[...].astype(jnp.bfloat16)
    vx = vx_ref[...].astype(jnp.bfloat16)
    q = jnp.dot(qx, wq_ref[...], preferred_element_type=jnp.float32) + bq_ref[...]
    k = jnp.dot(kx, wk_ref[...], preferred_element_type=jnp.float32) + bk_ref[...]
    v = jnp.dot(vx, wv_ref[...], preferred_element_type=jnp.float32) + bv_ref[...]
    qo_ref[...] = q.astype(qo_ref.dtype)
    ko_ref[...] = k.astype(ko_ref.dtype)
    vo_ref[...] = v.astype(vo_ref.dtype)


def fused_qkv_proj(qx, kx, vx, wq, wk, wv, bq, bk, bv, out_dtype=jnp.bfloat16):
    M, d_model = qx.shape
    n_dk = wq.shape[1]
    n_dv = wv.shape[1]
    tile_m = _pick_tile(M)
    act_spec = pl.BlockSpec((tile_m, d_model), lambda i: (i, 0))
    return pl.pallas_call(
        qkv_proj_kernel,
        out_shape=(
            jax.ShapeDtypeStruct((M, n_dk), out_dtype),
            jax.ShapeDtypeStruct((M, n_dk), out_dtype),
            jax.ShapeDtypeStruct((M, n_dv), out_dtype),
        ),
        grid=(M // tile_m,),
        in_specs=[
            act_spec, act_spec, act_spec,
            pl.BlockSpec((d_model, n_dk), lambda i: (0, 0)),
            pl.BlockSpec((d_model, n_dk), lambda i: (0, 0)),
            pl.BlockSpec((d_model, n_dv), lambda i: (0, 0)),
            pl.BlockSpec((1, n_dk), lambda i: (0, 0)),
            pl.BlockSpec((1, n_dk), lambda i: (0, 0)),
            pl.BlockSpec((1, n_dv), lambda i: (0, 0)),
        ],
        out_specs=(
            pl.BlockSpec((tile_m, n_dk), lambda i: (i, 0)),
            pl.BlockSpec((tile_m, n_dk), lambda i: (i, 0)),
            pl.BlockSpec((tile_m, n_dv), lambda i: (i, 0)),
        ),
        compiler_params=pltpu.CompilerParams(dimension_semantics=("parallel",)),
    )(qx, kx, vx, wq, wk, wv, bq, bk, bv)


# ---------- Stage 2: attention (all heads) + W_O + residual + LayerNorm -----

def attn_out_norm_kernel(q_ref, k_ref, v_ref, res_ref,
                         wo_ref, bo_ref, g_ref, bt_ref, o_ref, *, d_k, eps):
    q = q_ref[0]                       # (N, S, d_k)  bf16
    k = k_ref[0]                       # (N, S, d_k)  bf16
    v = v_ref[0]                       # (N, S, d_v)  bf16

    # Scores for all heads at once, contracting the last dims (no K transpose);
    # the 1/sqrt(d_k) scale is applied to the fp32 scores (same math as the
    # reference's K^T / sqrt(d_k)).
    s = jnp.einsum('nqd,nkd->nqk', q, k, preferred_element_type=jnp.float32)
    s = s * (1.0 / math.sqrt(d_k))
    # TODO(synk): optional `mask` argument (masked_fill_ with -1e9) not wired in;
    # the reference forward is exercised with mask=None.

    # Numerically stable softmax in fp32; the divide runs on the EUP.
    s = s - jnp.max(s, axis=-1, keepdims=True)
    p = jnp.exp(s)
    p = p * pl.reciprocal(jnp.sum(p, axis=-1, keepdims=True), approx=True)

    ctx = jnp.einsum('nqk,nkd->nqd', p.astype(v.dtype), v,
                     preferred_element_type=jnp.float32)          # (N, S, d_v)

    # W_O applied per head and summed over heads == the reference's
    # transpose(1,2).contiguous().view(B, S, N*d_v) @ W_O  (no transpose, and
    # the (S, N*d_v) context never leaves VMEM).
    y = jnp.einsum('nsd,nde->nse', ctx.astype(wo_ref.dtype), wo_ref[...],
                   preferred_element_type=jnp.float32).sum(axis=0)  # (S, d_model)

    x = y + bo_ref[...] + res_ref[0].astype(jnp.float32)

    # LayerNorm over the model dim (biased variance, eps=1e-5, PyTorch default).
    mean = jnp.mean(x, axis=-1, keepdims=True)
    var = jnp.mean(jnp.square(x - mean), axis=-1, keepdims=True)
    xn = (x - mean) * jax.lax.rsqrt(var + eps)
    o_ref[0] = (xn * g_ref[...] + bt_ref[...]).astype(o_ref.dtype)


# ------------------------------ wrapper -------------------------------------

@functools.partial(jax.jit, static_argnames=("N", "d_k", "d_v"))
def multi_head_atten(Q, K, V, params, *, N, d_k, d_v):
    B, S, d_model = Q.shape

    # Pre-cast MXU weights to bf16 once (fp32 accumulation in-kernel); reshape
    # W_O to per-head (N, d_v, d_model) — a free row-major reshape.
    wq = params["wq"].astype(jnp.bfloat16)
    wk = params["wk"].astype(jnp.bfloat16)
    wv = params["wv"].astype(jnp.bfloat16)
    wo3 = params["wo"].astype(jnp.bfloat16).reshape(N, d_v, d_model)

    q2d, k2d, v2d = fused_qkv_proj(
        Q.reshape(B * S, d_model),
        K.reshape(B * S, d_model),
        V.reshape(B * S, d_model),
        wq, wk, wv, params["bq"], params["bk"], params["bv"])

    # PyTorch `.view(batch, N, -1, d_k)`: row-major reshape, free (bitcast).
    qh = q2d.reshape(B, N, S, d_k)
    kh = k2d.reshape(B, N, S, d_k)
    vh = v2d.reshape(B, N, S, d_v)

    # One grid step per batch element, all heads batched inside the kernel;
    # "parallel" so v7x can shard batches across its 2 TensorCores.
    # TODO(synk): for long sequences, tile S flash-style (grid=(B, S//TILE_S))
    # so the (N, S, S) score block stays within VMEM.
    out = pl.pallas_call(
        functools.partial(attn_out_norm_kernel, d_k=d_k, eps=1e-5),
        out_shape=jax.ShapeDtypeStruct((B, S, d_model), Q.dtype),
        grid=(B,),
        in_specs=[
            pl.BlockSpec((1, N, S, d_k), lambda b: (b, 0, 0, 0)),
            pl.BlockSpec((1, N, S, d_k), lambda b: (b, 0, 0, 0)),
            pl.BlockSpec((1, N, S, d_v), lambda b: (b, 0, 0, 0)),
            pl.BlockSpec((1, S, d_model), lambda b: (b, 0, 0)),
            pl.BlockSpec((N, d_v, d_model), lambda b: (0, 0, 0)),
            pl.BlockSpec((1, d_model), lambda b: (0, 0)),
            pl.BlockSpec((1, d_model), lambda b: (0, 0)),
            pl.BlockSpec((1, d_model), lambda b: (0, 0)),
        ],
        out_specs=pl.BlockSpec((1, S, d_model), lambda b: (b, 0, 0)),
        compiler_params=pltpu.CompilerParams(dimension_semantics=("parallel",)),
    )(qh, kh, vh, Q, wo3, params["bo"], params["gamma"], params["beta"])
    return out


def init_params(key, N, d_model, d_k, d_v, dtype=jnp.float32):
    ks = jax.random.split(key, 8)

    def lin(kw, kb, d_in, d_out):
        # deterministic synthetic init (shapes match nn.Linear(d_in, d_out),
        # weights stored pre-transposed as (d_in, d_out) so kernels do x @ W + b)
        w = jax.random.normal(kw, (d_in, d_out), dtype) * 0.05
        b = jax.random.normal(kb, (1, d_out), dtype) * 0.01
        return w, b

    wq, bq = lin(ks[0], ks[1], d_model, N * d_k)
    wk, bk = lin(ks[2], ks[3], d_model, N * d_k)
    wv, bv = lin(ks[4], ks[5], d_model, N * d_v)
    wo, bo = lin(ks[6], ks[7], N * d_v, d_model)
    return dict(
        wq=wq, bq=bq, wk=wk, bk=bk, wv=wv, bv=bv, wo=wo, bo=bo,
        gamma=jnp.ones((1, d_model), dtype),   # nn.LayerNorm default weight
        beta=jnp.zeros((1, d_model), dtype),   # nn.LayerNorm default bias
    )


if __name__ == "__main__":
    # Small shapes consistent with the module: batch=2, seq=8, d_model=32,
    # N=4 heads, d_k=d_v=8.
    B, S, d_model = 2, 8, 32
    N, d_k, d_v = 4, 8, 8

    key = jax.random.PRNGKey(0)
    kq, kk, kv, kp = jax.random.split(key, 4)
    Q = jax.random.normal(kq, (B, S, d_model), jnp.float32)
    K = jax.random.normal(kk, (B, S, d_model), jnp.float32)
    V = jax.random.normal(kv, (B, S, d_model), jnp.float32)

    params = init_params(kp, N, d_model, d_k, d_v)

    out = multi_head_atten(Q, K, V, params, N=N, d_k=d_k, d_v=d_v)
    jax.block_until_ready(out)
    assert out.shape == (B, S, d_model), out.shape
    print("KERNEL_OK")
</pallas_src>

<mosaic_0001>
module attributes {stable_mosaic.version = 11 : i64} {
  func.func @qkv_proj_kernel(%arg0: i32, %arg1: memref<16x32xf32, #tpu.memory_space<vmem>>, %arg2: memref<16x32xf32, #tpu.memory_space<vmem>>, %arg3: memref<16x32xf32, #tpu.memory_space<vmem>>, %arg4: memref<32x32xbf16, #tpu.memory_space<vmem>>, %arg5: memref<32x32xbf16, #tpu.memory_space<vmem>>, %arg6: memref<32x32xbf16, #tpu.memory_space<vmem>>, %arg7: memref<1x32xf32, #tpu.memory_space<vmem>>, %arg8: memref<1x32xf32, #tpu.memory_space<vmem>>, %arg9: memref<1x32xf32, #tpu.memory_space<vmem>>, %arg10: memref<16x32xbf16, #tpu.memory_space<vmem>>, %arg11: memref<16x32xbf16, #tpu.memory_space<vmem>>, %arg12: memref<16x32xbf16, #tpu.memory_space<vmem>>) attributes {dimension_semantics = [#tpu.dimension_semantics<parallel>], iteration_bounds = array<i64: 1>, scalar_prefetch = 0 : i64, scratch_operands = 0 : i64, tpu.core_type = #tpu.core_type<tc>, window_params = [{transform_indices = @transform_0, window_bounds = array<i64: 16, 32>}, {transform_indices = @transform_1, window_bounds = array<i64: 16, 32>}, {transform_indices = @transform_2, window_bounds = array<i64: 16, 32>}, {pipeline_mode = #tpu.pipeline_mode<synchronous>, transform_indices = @transform_3, window_bounds = array<i64: 32, 32>}, {pipeline_mode = #tpu.pipeline_mode<synchronous>, transform_indices = @transform_4, window_bounds = array<i64: 32, 32>}, {pipeline_mode = #tpu.pipeline_mode<synchronous>, transform_indices = @transform_5, window_bounds = array<i64: 32, 32>}, {pipeline_mode = #tpu.pipeline_mode<synchronous>, transform_indices = @transform_6, window_bounds = array<i64: 1, 32>}, {pipeline_mode = #tpu.pipeline_mode<synchronous>, transform_indices = @transform_7, window_bounds = array<i64: 1, 32>}, {pipeline_mode = #tpu.pipeline_mode<synchronous>, transform_indices = @transform_8, window_bounds = array<i64: 1, 32>}, {transform_indices = @transform_9, window_bounds = array<i64: 16, 32>}, {transform_indices = @transform_10, window_bounds = array<i64: 16, 32>}, {transform_indices = @transform_11, window_bounds = array<i64: 16, 32>}]} {
    %c0 = arith.constant 0 : index
    %c0_0 = arith.constant 0 : index
    %0 = vector.load %arg1[%c0, %c0_0] : memref<16x32xf32, #tpu.memory_space<vmem>>, vector<16x32xf32>
    %1 = arith.truncf %0 : vector<16x32xf32> to vector<16x32xbf16>
    %c0_1 = arith.constant 0 : index
    %c0_2 = arith.constant 0 : index
    %2 = vector.load %arg2[%c0_1, %c0_2] : memref<16x32xf32, #tpu.memory_space<vmem>>, vector<16x32xf32>
    %3 = arith.truncf %2 : vector<16x32xf32> to vector<16x32xbf16>
    %c0_3 = arith.constant 0 : index
    %c0_4 = arith.constant 0 : index
    %4 = vector.load %arg3[%c0_3, %c0_4] : memref<16x32xf32, #tpu.memory_space<vmem>>, vector<16x32xf32>
    %5 = arith.truncf %4 : vector<16x32xf32> to vector<16x32xbf16>
    %c0_5 = arith.constant 0 : index
    %c0_6 = arith.constant 0 : index
    %6 = vector.load %arg4[%c0_5, %c0_6] : memref<32x32xbf16, #tpu.memory_space<vmem>>, vector<32x32xbf16>
    %cst = arith.constant dense<0.000000e+00> : vector<16x32xf32>
    %7 = tpu.matmul %1, %6, %cst {dimension_numbers = #tpu.dot_dimension_numbers<[1], [0], [0], [1], [0, 0, 1, 1], [], []>} : vector<16x32xbf16>, vector<32x32xbf16>, vector<16x32xf32> -> vector<16x32xf32>
    %c0_7 = arith.constant 0 : index
    %c0_8 = arith.constant 0 : index
    %8 = vector.load %arg7[%c0_7, %c0_8] : memref<1x32xf32, #tpu.memory_space<vmem>>, vector<1x32xf32>
    %9 = vector.broadcast %8 : vector<1x32xf32> to vector<16x32xf32>
    %10 = arith.addf %7, %9 : vector<16x32xf32>
    %c0_9 = arith.constant 0 : index
    %c0_10 = arith.constant 0 : index
    %11 = vector.load %arg5[%c0_9, %c0_10] : memref<32x32xbf16, #tpu.memory_space<vmem>>, vector<32x32xbf16>
    %cst_11 = arith.constant dense<0.000000e+00> : vector<16x32xf32>
    %12 = tpu.matmul %3, %11, %cst_11 {dimension_numbers = #tpu.dot_dimension_numbers<[1], [0], [0], [1], [0, 0, 1, 1], [], []>} : vector<16x32xbf16>, vector<32x32xbf16>, vector<16x32xf32> -> vector<16x32xf32>
    %c0_12 = arith.constant 0 : index
    %c0_13 = arith.constant 0 : index
    %13 = vector.load %arg8[%c0_12, %c0_13] : memref<1x32xf32, #tpu.memory_space<vmem>>, vector<1x32xf32>
    %14 = vector.broadcast %13 : vector<1x32xf32> to vector<16x32xf32>
    %15 = arith.addf %12, %14 : vector<16x32xf32>
    %c0_14 = arith.constant 0 : index
    %c0_15 = arith.constant 0 : index
    %16 = vector.load %arg6[%c0_14, %c0_15] : memref<32x32xbf16, #tpu.memory_space<vmem>>, vector<32x32xbf16>
    %cst_16 = arith.constant dense<0.000000e+00> : vector<16x32xf32>
    %17 = tpu.matmul %5, %16, %cst_16 {dimension_numbers = #tpu.dot_dimension_numbers<[1], [0], [0], [1], [0, 0, 1, 1], [], []>} : vector<16x32xbf16>, vector<32x32xbf16>, vector<16x32xf32> -> vector<16x32xf32>
    %c0_17 = arith.constant 0 : index
    %c0_18 = arith.constant 0 : index
    %18 = vector.load %arg9[%c0_17, %c0_18] : memref<1x32xf32, #tpu.memory_space<vmem>>, vector<1x32xf32>
    %19 = vector.broadcast %18 : vector<1x32xf32> to vector<16x32xf32>
    %20 = arith.addf %17, %19 : vector<16x32xf32>
    %21 = arith.truncf %10 : vector<16x32xf32> to vector<16x32xbf16>
    %c0_19 = arith.constant 0 : index
    %c0_20 = arith.constant 0 : index
    %22 = vector.load %arg10[%c0_19, %c0_20] : memref<16x32xbf16, #tpu.memory_space<vmem>>, vector<16x32xbf16>
    tpu.vector_store %arg10[%c0_19, %c0_20], %21 {strides = array<i32>} : memref<16x32xbf16, #tpu.memory_space<vmem>>, vector<16x32xbf16>,
    %23 = arith.truncf %15 : vector<16x32xf32> to vector<16x32xbf16>
    %c0_21 = arith.constant 0 : index
    %c0_22 = arith.constant 0 : index
    %24 = vector.load %arg11[%c0_21, %c0_22] : memref<16x32xbf16, #tpu.memory_space<vmem>>, vector<16x32xbf16>
    tpu.vector_store %arg11[%c0_21, %c0_22], %23 {strides = array<i32>} : memref<16x32xbf16, #tpu.memory_space<vmem>>, vector<16x32xbf16>,
    %25 = arith.truncf %20 : vector<16x32xf32> to vector<16x32xbf16>
    %c0_23 = arith.constant 0 : index
    %c0_24 = arith.constant 0 : index
    %26 = vector.load %arg12[%c0_23, %c0_24] : memref<16x32xbf16, #tpu.memory_space<vmem>>, vector<16x32xbf16>
    tpu.vector_store %arg12[%c0_23, %c0_24], %25 {strides = array<i32>} : memref<16x32xbf16, #tpu.memory_space<vmem>>, vector<16x32xbf16>,
    return
  }
  func.func @transform_0(%arg0: i32) -> (i32, i32) {
    %c0_i32 = arith.constant 0 : i32
    %c0_i32_0 = arith.constant 0 : i32
    return %arg0, %c0_i32 : i32, i32
  }
  func.func @transform_1(%arg0: i32) -> (i32, i32) {
    %c0_i32 = arith.constant 0 : i32
    %c0_i32_0 = arith.constant 0 : i32
    return %arg0, %c0_i32 : i32, i32
  }
  func.func @transform_2(%arg0: i32) -> (i32, i32) {
    %c0_i32 = arith.constant 0 : i32
    %c0_i32_0 = arith.constant 0 : i32
    return %arg0, %c0_i32 : i32, i32
  }
  func.func @transform_3(%arg0: i32) -> (i32, i32) {
    %c0_i32 = arith.constant 0 : i32
    %c0_i32_0 = arith.constant 0 : i32
    %c0_i32_1 = arith.constant 0 : i32
    return %c0_i32, %c0_i32_0 : i32, i32
  }
  func.func @transform_4(%arg0: i32) -> (i32, i32) {
    %c0_i32 = arith.constant 0 : i32
    %c0_i32_0 = arith.constant 0 : i32
    %c0_i32_1 = arith.constant 0 : i32
    return %c0_i32, %c0_i32_0 : i32, i32
  }
  func.func @transform_5(%arg0: i32) -> (i32, i32) {
    %c0_i32 = arith.constant 0 : i32
    %c0_i32_0 = arith.constant 0 : i32
    %c0_i32_1 = arith.constant 0 : i32
    return %c0_i32, %c0_i32_0 : i32, i32
  }
  func.func @transform_6(%arg0: i32) -> (i32, i32) {
    %c0_i32 = arith.constant 0 : i32
    %c0_i32_0 = arith.constant 0 : i32
    %c0_i32_1 = arith.constant 0 : i32
    return %c0_i32, %c0_i32_0 : i32, i32
  }
  func.func @transform_7(%arg0: i32) -> (i32, i32) {
    %c0_i32 = arith.constant 0 : i32
    %c0_i32_0 = arith.constant 0 : i32
    %c0_i32_1 = arith.constant 0 : i32
    return %c0_i32, %c0_i32_0 : i32, i32
  }
  func.func @transform_8(%arg0: i32) -> (i32, i32) {
    %c0_i32 = arith.constant 0 : i32
    %c0_i32_0 = arith.constant 0 : i32
    %c0_i32_1 = arith.constant 0 : i32
    return %c0_i32, %c0_i32_0 : i32, i32
  }
  func.func @transform_9(%arg0: i32) -> (i32, i32) {
    %c0_i32 = arith.constant 0 : i32
    %c0_i32_0 = arith.constant 0 : i32
    return %arg0, %c0_i32 : i32, i32
  }
  func.func @transform_10(%arg0: i32) -> (i32, i32) {
    %c0_i32 = arith.constant 0 : i32
    %c0_i32_0 = arith.constant 0 : i32
    return %arg0, %c0_i32 : i32, i32
  }
  func.func @transform_11(%arg0: i32) -> (i32, i32) {
    %c0_i32 = arith.constant 0 : i32
    %c0_i32_0 = arith.constant 0 : i32
    return %arg0, %c0_i32 : i32, i32
  }
}

module attributes {stable_mosaic.version = 11 : i64} {
  func.func @attn_out_norm_kernel(%arg0: i32, %arg1: memref<1x4x8x8xbf16, #tpu.memory_space<vmem>>, %arg2: memref<1x4x8x8xbf16, #tpu.memory_space<vmem>>, %arg3: memref<1x4x8x8xbf16, #tpu.memory_space<vmem>>, %arg4: memref<1x8x32xf32, #tpu.memory_space<vmem>>, %arg5: memref<4x8x32xbf16, #tpu.memory_space<vmem>>, %arg6: memref<1x32xf32, #tpu.memory_space<vmem>>, %arg7: memref<1x32xf32, #tpu.memory_space<vmem>>, %arg8: memref<1x32xf32, #tpu.memory_space<vmem>>, %arg9: memref<1x8x32xf32, #tpu.memory_space<vmem>>) attributes {dimension_semantics = [#tpu.dimension_semantics<parallel>], iteration_bounds = array<i64: 2>, scalar_prefetch = 0 : i64, scratch_operands = 0 : i64, tpu.core_type = #tpu.core_type<tc>, window_params = [{transform_indices = @transform_0, window_bounds = array<i64: 1, 4, 8, 8>}, {transform_indices = @transform_1, window_bounds = array<i64: 1, 4, 8, 8>}, {transform_indices = @transform_2, window_bounds = array<i64: 1, 4, 8, 8>}, {transform_indices = @transform_3, window_bounds = array<i64: 1, 8, 32>}, {pipeline_mode = #tpu.pipeline_mode<synchronous>, transform_indices = @transform_4, window_bounds = array<i64: 4, 8, 32>}, {pipeline_mode = #tpu.pipeline_mode<synchronous>, transform_indices = @transform_5, window_bounds = array<i64: 1, 32>}, {pipeline_mode = #tpu.pipeline_mode<synchronous>, transform_indices = @transform_6, window_bounds = array<i64: 1, 32>}, {pipeline_mode = #tpu.pipeline_mode<synchronous>, transform_indices = @transform_7, window_bounds = array<i64: 1, 32>}, {transform_indices = @transform_8, window_bounds = array<i64: 1, 8, 32>}]} {
    %c0 = arith.constant 0 : index
    %c0_0 = arith.constant 0 : index
    %c0_1 = arith.constant 0 : index
    %c0_2 = arith.constant 0 : index
    %0 = vector.load %arg1[%c0, %c0_0, %c0_1, %c0_2] : memref<1x4x8x8xbf16, #tpu.memory_space<vmem>>, vector<1x4x8x8xbf16>
    %1 = vector.shape_cast %0 : vector<1x4x8x8xbf16> to vector<4x8x8xbf16>
    %c0_3 = arith.constant 0 : index
    %c0_4 = arith.constant 0 : index
    %c0_5 = arith.constant 0 : index
    %c0_6 = arith.constant 0 : index
    %2 = vector.load %arg2[%c0_3, %c0_4, %c0_5, %c0_6] : memref<1x4x8x8xbf16, #tpu.memory_space<vmem>>, vector<1x4x8x8xbf16>
    %3 = vector.shape_cast %2 : vector<1x4x8x8xbf16> to vector<4x8x8xbf16>
    %c0_7 = arith.constant 0 : index
    %c0_8 = arith.constant 0 : index
    %c0_9 = arith.constant 0 : index
    %c0_10 = arith.constant 0 : index
    %4 = vector.load %arg3[%c0_7, %c0_8, %c0_9, %c0_10] : memref<1x4x8x8xbf16, #tpu.memory_space<vmem>>, vector<1x4x8x8xbf16>
    %5 = vector.shape_cast %4 : vector<1x4x8x8xbf16> to vector<4x8x8xbf16>
    "tpu.trace_start"() <{level = 10 : i32, message = "nqd,nkd->nqk"}> : () -> ()
    %cst = arith.constant dense<0.000000e+00> : vector<4x8x8xf32>
    %6 = tpu.matmul %1, %3, %cst {dimension_numbers = #tpu.dot_dimension_numbers<[2], [2], [1], [1], [0, 0, 0, 1, 1, 1], [0], [0]>} : vector<4x8x8xbf16>, vector<4x8x8xbf16>, vector<4x8x8xf32> -> vector<4x8x8xf32>
    "tpu.trace_stop"() : () -> ()
    %cst_11 = arith.constant 0.353553385 : f32
    %7 = vector.broadcast %cst_11 : f32 to vector<4x8x8xf32>
    %8 = arith.mulf %6, %7 : vector<4x8x8xf32>
    %cst_12 = arith.constant dense<0xFF800000> : vector<4x8xf32>
    %9 = vector.multi_reduction <maximumf>, %8, %cst_12 [2] : vector<4x8x8xf32> to vector<4x8xf32>
    %10 = vector.shape_cast %9 : vector<4x8xf32> to vector<4x8x1xf32>
    %11 = vector.broadcast %10 : vector<4x8x1xf32> to vector<4x8x8xf32>
    %12 = arith.subf %8, %11 : vector<4x8x8xf32>
    %13 = math.exp %12 : vector<4x8x8xf32>
    %cst_13 = arith.constant dense<0.000000e+00> : vector<4x8xf32>
    %14 = vector.multi_reduction <add>, %13, %cst_13 [2] : vector<4x8x8xf32> to vector<4x8xf32>
    %15 = vector.shape_cast %14 : vector<4x8xf32> to vector<4x8x1xf32>
    %16 = tpu.reciprocal %15 {approx = true} : vector<4x8x1xf32> -> vector<4x8x1xf32>
    %17 = vector.broadcast %16 : vector<4x8x1xf32> to vector<4x8x8xf32>
    %18 = arith.mulf %13, %17 : vector<4x8x8xf32>
    %19 = arith.truncf %18 : vector<4x8x8xf32> to vector<4x8x8xbf16>
    "tpu.trace_start"() <{level = 10 : i32, message = "nqk,nkd->nqd"}> : () -> ()
    %cst_14 = arith.constant dense<0.000000e+00> : vector<4x8x8xf32>
    %20 = tpu.matmul %19, %5, %cst_14 {dimension_numbers = #tpu.dot_dimension_numbers<[2], [1], [1], [2], [0, 0, 0, 1, 1, 2], [0], [0]>} : vector<4x8x8xbf16>, vector<4x8x8xbf16>, vector<4x8x8xf32> -> vector<4x8x8xf32>
    "tpu.trace_stop"() : () -> ()
    %21 = arith.truncf %20 : vector<4x8x8xf32> to vector<4x8x8xbf16>
    %c0_15 = arith.constant 0 : index
    %c0_16 = arith.constant 0 : index
    %c0_17 = arith.constant 0 : index
    %22 = vector.load %arg5[%c0_15, %c0_16, %c0_17] : memref<4x8x32xbf16, #tpu.memory_space<vmem>>, vector<4x8x32xbf16>
    "tpu.trace_start"() <{level = 10 : i32, message = "nsd,nde->nse"}> : () -> ()
    %cst_18 = arith.constant dense<0.000000e+00> : vector<4x8x32xf32>
    %23 = tpu.matmul %21, %22, %cst_18 {dimension_numbers = #tpu.dot_dimension_numbers<[2], [1], [1], [2], [0, 0, 0, 1, 1, 2], [0], [0]>} : vector<4x8x8xbf16>, vector<4x8x32xbf16>, vector<4x8x32xf32> -> vector<4x8x32xf32>
    "tpu.trace_stop"() : () -> ()
    %cst_19 = arith.constant dense<0.000000e+00> : vector<8x32xf32>
    %24 = vector.multi_reduction <add>, %23, %cst_19 [0] : vector<4x8x32xf32> to vector<8x32xf32>
    %c0_20 = arith.constant 0 : index
    %c0_21 = arith.constant 0 : index
    %25 = vector.load %arg6[%c0_20, %c0_21] : memref<1x32xf32, #tpu.memory_space<vmem>>, vector<1x32xf32>
    %26 = vector.broadcast %25 : vector<1x32xf32> to vector<8x32xf32>
    %27 = arith.addf %24, %26 : vector<8x32xf32>
    %c0_22 = arith.constant 0 : index
    %c0_23 = arith.constant 0 : index
    %c0_24 = arith.constant 0 : index
    %28 = vector.load %arg4[%c0_22, %c0_23, %c0_24] : memref<1x8x32xf32, #tpu.memory_space<vmem>>, vector<1x8x32xf32>
    %29 = vector.shape_cast %28 : vector<1x8x32xf32> to vector<8x32xf32>
    %30 = arith.addf %27, %29 : vector<8x32xf32>
    %cst_25 = arith.constant dense<0.000000e+00> : vector<8xf32>
    %31 = vector.multi_reduction <add>, %30, %cst_25 [1] : vector<8x32xf32> to vector<8xf32>
    %32 = vector.shape_cast %31 : vector<8xf32> to vector<8x1xf32>
    %cst_26 = arith.constant 3.200000e+01 : f32
    %33 = vector.broadcast %cst_26 : f32 to vector<8x1xf32>
    %34 = arith.divf %32, %33 : vector<8x1xf32>
    %35 = vector.broadcast %34 : vector<8x1xf32> to vector<8x32xf32>
    %36 = arith.subf %30, %35 : vector<8x32xf32>
    %37 = arith.mulf %36, %36 : vector<8x32xf32>
    %cst_27 = arith.constant dense<0.000000e+00> : vector<8xf32>
    %38 = vector.multi_reduction <add>, %37, %cst_27 [1] : vector<8x32xf32> to vector<8xf32>
    %39 = vector.shape_cast %38 : vector<8xf32> to vector<8x1xf32>
    %cst_28 = arith.constant 3.200000e+01 : f32
    %40 = vector.broadcast %cst_28 : f32 to vector<8x1xf32>
    %41 = arith.divf %39, %40 : vector<8x1xf32>
    %42 = vector.broadcast %34 : vector<8x1xf32> to vector<8x32xf32>
    %43 = arith.subf %30, %42 : vector<8x32xf32>
    %cst_29 = arith.constant 9.99999974E-6 : f32
    %44 = vector.broadcast %cst_29 : f32 to vector<8x1xf32>
    %45 = arith.addf %41, %44 : vector<8x1xf32>
    %46 = math.rsqrt %45 : vector<8x1xf32>
    %47 = vector.broadcast %46 : vector<8x1xf32> to vector<8x32xf32>
    %48 = arith.mulf %43, %47 : vector<8x32xf32>
    %c0_30 = arith.constant 0 : index
    %c0_31 = arith.constant 0 : index
    %49 = vector.load %arg7[%c0_30, %c0_31] : memref<1x32xf32, #tpu.memory_space<vmem>>, vector<1x32xf32>
    %50 = vector.broadcast %49 : vector<1x32xf32> to vector<8x32xf32>
    %51 = arith.mulf %48, %50 : vector<8x32xf32>
    %c0_32 = arith.constant 0 : index
    %c0_33 = arith.constant 0 : index
    %52 = vector.load %arg8[%c0_32, %c0_33] : memref<1x32xf32, #tpu.memory_space<vmem>>, vector<1x32xf32>
    %53 = vector.broadcast %52 : vector<1x32xf32> to vector<8x32xf32>
    %54 = arith.addf %51, %53 : vector<8x32xf32>
    %c0_34 = arith.constant 0 : index
    %c0_35 = arith.constant 0 : index
    %c0_36 = arith.constant 0 : index
    %55 = vector.load %arg9[%c0_34, %c0_35, %c0_36] : memref<1x8x32xf32, #tpu.memory_space<vmem>>, vector<1x8x32xf32>
    %56 = vector.shape_cast %55 : vector<1x8x32xf32> to vector<8x32xf32>
    %57 = vector.shape_cast %54 : vector<8x32xf32> to vector<1x8x32xf32>
    tpu.vector_store %arg9[%c0_34, %c0_35, %c0_36], %57 {strides = array<i32>} : memref<1x8x32xf32, #tpu.memory_space<vmem>>, vector<1x8x32xf32>,
    return
  }
  func.func @transform_0(%arg0: i32) -> (i32, i32, i32, i32) {
    %c0_i32 = arith.constant 0 : i32
    %c0_i32_0 = arith.constant 0 : i32
    %c0_i32_1 = arith.constant 0 : i32
    %c0_i32_2 = arith.constant 0 : i32
    return %arg0, %c0_i32, %c0_i32_0, %c0_i32_1 : i32, i32, i32, i32
  }
  func.func @transform_1(%arg0: i32) -> (i32, i32, i32, i32) {
    %c0_i32 = arith.constant 0 : i32
    %c0_i32_0 = arith.constant 0 : i32
    %c0_i32_1 = arith.constant 0 : i32
    %c0_i32_2 = arith.constant 0 : i32
    return %arg0, %c0_i32, %c0_i32_0, %c0_i32_1 : i32, i32, i32, i32
  }
  func.func @transform_2(%arg0: i32) -> (i32, i32, i32, i32) {
    %c0_i32 = arith.constant 0 : i32
    %c0_i32_0 = arith.constant 0 : i32
    %c0_i32_1 = arith.constant 0 : i32
    %c0_i32_2 = arith.constant 0 : i32
    return %arg0, %c0_i32, %c0_i32_0, %c0_i32_1 : i32, i32, i32, i32
  }
  func.func @transform_3(%arg0: i32) -> (i32, i32, i32) {
    %c0_i32 = arith.constant 0 : i32
    %c0_i32_0 = arith.constant 0 : i32
    %c0_i32_1 = arith.constant 0 : i32
    return %arg0, %c0_i32, %c0_i32_0 : i32, i32, i32
  }
  func.func @transform_4(%arg0: i32) -> (i32, i32, i32) {
    %c0_i32 = arith.constant 0 : i32
    %c0_i32_0 = arith.constant 0 : i32
    %c0_i32_1 = arith.constant 0 : i32
    %c0_i32_2 = arith.constant 0 : i32
    return %c0_i32, %c0_i32_0, %c0_i32_1 : i32, i32, i32
  }
  func.func @transform_5(%arg0: i32) -> (i32, i32) {
    %c0_i32 = arith.constant 0 : i32
    %c0_i32_0 = arith.constant 0 : i32
    %c0_i32_1 = arith.constant 0 : i32
    return %c0_i32, %c0_i32_0 : i32, i32
  }
  func.func @transform_6(%arg0: i32) -> (i32, i32) {
    %c0_i32 = arith.constant 0 : i32
    %c0_i32_0 = arith.constant 0 : i32
    %c0_i32_1 = arith.constant 0 : i32
    return %c0_i32, %c0_i32_0 : i32, i32
  }
  func.func @transform_7(%arg0: i32) -> (i32, i32) {
    %c0_i32 = arith.constant 0 : i32
    %c0_i32_0 = arith.constant 0 : i32
    %c0_i32_1 = arith.constant 0 : i32
    return %c0_i32, %c0_i32_0 : i32, i32
  }
  func.func @transform_8(%arg0: i32) -> (i32, i32, i32) {
    %c0_i32 = arith.constant 0 : i32
    %c0_i32_0 = arith.constant 0 : i32
    %c0_i32_1 = arith.constant 0 : i32
    return %arg0, %c0_i32, %c0_i32_0 : i32, i32, i32
  }
}

</mosaic_0001>

<bundles_post_ra>
// kernel: multi_head_atten.2
= control target key start
LH: loop header
LB: loop body
LE: loop exit
PB: predicated region body
PF: predicated region fallthrough
CT: control target
= control target key end

     0   :  { %v355_v0 = vmov 0.0   ;;  %vm356_vm0 = vmmov 0   ;;  %vm68_vm1 = vcmask 261120   ;;  %vm255_vm2 = vcmask 257024   ;;  %s492_s3 = inlined_call_operand.vmem [shape: bf16[32,32], index: 3, kind: input, shape index: {}]   ;;  %s493_s4 = inlined_call_operand.vmem [shape: bf16[32,32], index: 4, kind: input, shape index: {}]   ;;  %s494_s0 = inlined_call_operand.vmem [shape: f32[16,32], index: 0, kind: input, shape index: {}]   ;;  %s495_s5 = inlined_call_operand.vmem [shape: bf16[32,32], index: 5, kind: input, shape index: {}]   ;;  %s496_s1 = inlined_call_operand.vmem [shape: f32[16,32], index: 1, kind: input, shape index: {}]   ;;  %s497_s2 = inlined_call_operand.vmem [shape: f32[16,32], index: 2, kind: input, shape index: {}]   ;;  %s498_s6 = inlined_call_operand.vmem [shape: f32[1,32], index: 6, kind: input, shape index: {}]   ;;  %s499_s7 = inlined_call_operand.vmem [shape: f32[1,32], index: 7, kind: input, shape index: {}]   ;;  %s500_s9 = inlined_call_operand.vmem [shape: bf16[16,32], index: 9, kind: output, shape index: {0}]   ;;  %s501_s8 = inlined_call_operand.vmem [shape: f32[1,32], index: 8, kind: input, shape index: {}]   ;;  %s502_s10 = inlined_call_operand.vmem [shape: bf16[16,32], index: 10, kind: output, shape index: {1}]   ;;  %s503_s11 = inlined_call_operand.vmem [shape: bf16[16,32], index: 11, kind: output, shape index: {2}]  }
   0x1   :  { %323 = vmatprep.subr.bf16.mxu0 %v355_v0  ;;  %v349_v1 = vld [vmem:[%s492_s3] sm:$0xff]   ;;  %331 = vmatprep.subr.bf16.mxu1 %v355_v0  ;;  %v350_v2 = vld [vmem:[%s492_s3 + $0x8] sm:$0xff]  }
   0x2   :  { %327 = vmatprep.mubr.msk.bf16.mxu0 %vm356_vm0, %v355_v0  ;;  %335 = vmatprep.mubr.msk.bf16.mxu1 %vm356_vm0, %v355_v0  ;;  %v351_v3 = vld [vmem:[%s493_s4] sm:$0xff]   ;;  %v37_v5 = vld [vmem:[%s494_s0 + $0x8] sm:$0xff] }
   0x3   :  { %324 = vmatpush3.bf16.msra.mxu0 %v349_v1  ;;  %v36_v4 = vld [vmem:[%s494_s0] sm:$0xff]  ;;  %332 = vmatpush3.bf16.msra.mxu1 %v351_v3  ;;  %v353_v7 = vld [vmem:[%s493_s4 + $0x8] sm:$0xff]  }
   0x4   :  { %325 = vmatprep.subr.bf16.mxu0 %v355_v0  ;;  %v38_v6 = vpack.c.bf16 %v37_v5, %v36_v4  ;;  %333 = vmatprep.subr.bf16.mxu1 %v355_v0  ;;  %v352_v8 = vld [vmem:[%s495_s5] sm:$0xff]   ;;  %v40_v10 = vld [vmem:[%s496_s1 + $0x8] sm:$0xff] }
   0x5   :  { %v39_v9 = vld [vmem:[%s496_s1] sm:$0xff]  ;;  %v354_v12 = vld [vmem:[%s495_s5 + $0x8] sm:$0xff]  }
   0x6   :  { %v41_v11 = vpack.c.bf16 %v40_v10, %v39_v9  ;;  %v42_v13 = vld [vmem:[%s497_s2] sm:$0xff]  ;;  %v43_v14 = vld [vmem:[%s497_s2 + $0x8] sm:$0xff] }
   0x7   :  { %326 = vmatpush3.bf16.msra.mxu0 %v350_v2  ;;  %334 = vmatpush3.bf16.msra.mxu1 %v353_v7  ;;  %v44_v15 = vpack.c.bf16 %v43_v14, %v42_v13  ;;  %v290_v16 = vld [vmem:[%s498_s6] ss:$0 sm:$0xff] }
   0x8   :  { %339 = vmatprep.subr.bf16.mxu0 %v355_v0  ;;  %v294_v18 = vld [vmem:[%s499_s7] ss:$0 sm:$0xff] }
   0x9   :  { %v298_v33 = vld [vmem:[%s501_s8] ss:$0 sm:$0xff] }
   0xa   :  { %328 = vmatmul.mubr.msk.bf16.vlgmr.msra.gmra.mrb[0].mxu0 %vm68_vm1, %v38_v6  ;;  %336 = vmatmul.mubr.msk.bf16.vlgmr.msra.gmra.mrb[0].mxu1 %vm68_vm1, %v41_v11 }
   0xb   :  { %340 = vmatpush3.bf16.msra.mxu0 %v352_v8  ;;  %343 = vmatprep.mubr.msk.bf16.mxu0 %vm356_vm0, %v355_v0 }
   0xc   :  { %341 = vmatprep.subr.bf16.mxu0 %v355_v0 }
   0xf   :  { %342 = vmatpush3.bf16.msra.mxu0 %v354_v12 }
  0x12   :  { %344 = vmatmul.mubr.msk.bf16.vlgmr.msra.gmra.mrb[4].mxu0 %vm68_vm1, %v44_v15 }
  0xdd   :  { %v106_v17 = vpop.f32.mrb[0].mxu0  ;;  %v173_v22 = vpop.f32.mrb[0].mxu1 }
  0xde   :  { %v107_v19 = vadd.f32 %v290_v16, %v106_v17  ;;  %v329_v20 = vpop.f32.mrb[1].mxu0  ;;  %v174_v26 = vadd.f32 %v294_v18, %v173_v22  ;;  %v337_v27 = vpop.f32.mrb[1].mxu1 }
  0xdf   :  { %v109_v21 = vpop.f32.mrb[2].mxu0  ;;  %v176_v28 = vpop.f32.mrb[2].mxu1 }
  0xe0   :  { %v308_v23 = vpack.c.bf16 %v107_v19, %v107_v19  ;;  %v110_v24 = vadd.f32 %v290_v16, %v109_v21  ;;  %v330_v25 = vpop.f32.mrb[3].mxu0  ;;  %v310_v30 = vpack.c.bf16 %v174_v26, %v174_v26  ;;  %v177_v31 = vadd.f32 %v294_v18, %v176_v28  ;;  %v338_v32 = vpop.f32.mrb[3].mxu1 }
  0xe2   :  { %256 = vst.msk [vmem:[%s500_s9] sm:$0xf] %vm255_vm2, %v308_v23  ;;  %v309_v29 = vpack.c.bf16 %v110_v24, %v110_v24  ;;  %266 = vst.msk [vmem:[%s502_s10] sm:$0xf] %vm255_vm2, %v310_v30  ;;  %v311_v34 = vpack.c.bf16 %v177_v31, %v177_v31 }
  0xe4   :  { %257 = vst.msk [vmem:[%s500_s9 + $0x4] sm:$0xf] %vm255_vm2, %v309_v29  ;;  %267 = vst.msk [vmem:[%s502_s10 + $0x4] sm:$0xf] %vm255_vm2, %v311_v34 }
  0xe5   :  { %v240_v35 = vpop.f32.mrb[4].mxu0 }
  0xe6   :  { %v241_v36 = vadd.f32 %v298_v33, %v240_v35  ;;  %v345_v37 = vpop.f32.mrb[5].mxu0 }
  0xe7   :  { %v243_v38 = vpop.f32.mrb[6].mxu0 }
  0xe8   :  { %v312_v39 = vpack.c.bf16 %v241_v36, %v241_v36  ;;  %v244_v40 = vadd.f32 %v298_v33, %v243_v38  ;;  %v346_v41 = vpop.f32.mrb[7].mxu0 }
  0xea   :  { %276 = vst.msk [vmem:[%s503_s11] sm:$0xf] %vm255_vm2, %v312_v39  ;;  %v313_v42 = vpack.c.bf16 %v244_v40, %v244_v40 }
  0xec   :  { %277 = vst.msk [vmem:[%s503_s11 + $0x4] sm:$0xf] %vm255_vm2, %v313_v42 }

// kernel: multi_head_atten.3
= control target key start
LH: loop header
LB: loop body
LE: loop exit
PB: predicated region body
PF: predicated region fallthrough
CT: control target
= control target key end

     0   :  { %13 = vsyncpa [#allocation3], 0  ;;  %s1661_s0 = inlined_call_operand.vmem [shape: bf16[2,4,8,8], index: 0, kind: input, shape index: {}]   ;;  %s1662_s1 = inlined_call_operand.vmem [shape: bf16[2,4,8,8], index: 1, kind: input, shape index: {}]   ;;  %s1663_s2 = inlined_call_operand.vmem [shape: bf16[2,4,8,8], index: 2, kind: input, shape index: {}]   ;;  %s1664_s3 = inlined_call_operand.vmem [shape: f32[2,8,32], index: 3, kind: input, shape index: {}]   ;;  %s1665_s4 = inlined_call_operand.vmem [shape: bf16[4,8,32], index: 4, kind: input, shape index: {}]   ;;  %s1666_s5 = inlined_call_operand.vmem [shape: f32[1,32], index: 5, kind: input, shape index: {}]   ;;  %s1667_s6 = inlined_call_operand.vmem [shape: f32[1,32], index: 6, kind: input, shape index: {}]   ;;  %s1668_s7 = inlined_call_operand.vmem [shape: f32[1,32], index: 7, kind: input, shape index: {}]   ;;  %s1669_s8 = inlined_call_operand.hbm [shape: f32[2,8,32], index: 8, kind: output, shape index: {}]  }
   0x1   :  { %15 = vsyncpa [#allocation3 + $0x1], 0  ;;  %s1447_s27 = smov 0   ;;  %s1449_s28 = smov 0  }
   0x2   :  { %s1451_s29 = smov 0   ;;  %s1453_s30 = smov 0  }
   0x3 LB: > { %s1468_s9 = sadd.s32 4294967295, %s1397_s30   ;;  %s1146_s10 = sadd.s32 4294967294, %s1397_s30   ;;  %s1397_s30 = sphi %s1453_s30, %s1675_s30   ;;  %s1393_s29 = sphi %s1451_s29, %s1674_s29   ;;  %s1389_s28 = sphi %s1449_s28, %s1673_s28   ;;  %s1385_s27 = sphi %s1447_s27, %s1672_s27  }
   0x4   : > { %s1472_s11 = sadd.s32 1, %s1397_s30   ;;  %s216_s12 = sadd.s32 1, %s1393_s29 }
   0x5   : > { %s213_s13 = ssub.s32 %s1397_s30, %s1472_s11  ;;  %p226_p0 = scmp.ne.s32.totalorder %s1393_s29, %s1389_s28 }
   0x6   : > { %p214_p1 = scmp.eq.s32.totalorder %s213_s13, 0  ;;  %p227_p2 = scmp.eq.s32.totalorder %s1468_s9, 1 }
   0x7   : > { %p232_p3 = scmp.ne.s32.totalorder %s1389_s28, %s1385_s27  ;;  %p233_p4 = scmp.eq.s32.totalorder %s1146_s10, 1 }
   0x8   : > { %s1483_s14 = scalar_select %p214_p1, %s1393_s29, %s216_s12  }
   0x9   : > { %p1485_p5 = por %p227_p2, %p226_p0  ;;  %p1489_p6 = por %p233_p4, %p232_p3 }
   0xa   : > { %p1149_p7 = scmp.ge.s32.totalorder %s1397_s30, 1  ;;  %p294_p8 = scmp.lt.s32.totalorder %s1397_s30, 3 }
   0xc   : > { %p295_p9 = pnand %p1149_p7, %p294_p8 }
   0xd   : > { %p342_p10 = scmp.lt.s32.totalorder (!%p295_p9), %s1468_s9, 1  ;;  %v1399_v0 = vmov (!%p295_p9), 0.0   ;;  %vm1400_vm0 = vmmov (!%p295_p9), 0   ;;  %vm374_vm1 = vcmask (!%p295_p9), 64512   ;;  %vm614_vm2 = vcmask (!%p295_p9), 1043456   ;;  %s1174_s23 = sshll.u32 (!%p295_p9), %s1468_s9, 7 }
   0xe   : > { %298 = sbr.rel (%p295_p9) target bundleno = 1336 (0x538), region = 52  ;;  %1204 = vmatprep.subr.bf16.mxu0 (!%p295_p9), %v1399_v0  ;;  %1210 = vmatprep.subr.bf16.mxu1 (!%p295_p9), %v1399_v0  ;;  %vm988_vm3 = vcmask (!%p295_p9), 261120   ;;  %s1618_s12 = scalar_lea.hbm (!%p295_p9), %s1669_s8, %s1174_s23 }
   0xf   : > { %1206 = vmatprep.mubr.msk.bf16.mxu0 (!%p295_p9), %vm1400_vm0, %v1399_v0  ;;  %1212 = vmatprep.mubr.msk.bf16.mxu1 (!%p295_p9), %vm1400_vm0, %v1399_v0 }
  0x15   : > { %s1499_s17 = scalar_select %p342_p10, %s1468_s9, 1 }
  0x16   : > { %s1401_s9 = smov [#allocation2]  }
  0x17   : > { %s1506_s18 = sshll.u32 %s1499_s17, 4 }
  0x18   : > { %s351_s21 = scalar_lea.vmem %s1662_s1, %s1506_s18  ;;  %s346_s24 = scalar_lea.vmem %s1661_s0, %s1506_s18 }
  0x19   : > { %v366_v1 = vld [vmem:[%s351_s21] sm:$0xf]  ;;  %v367_v2 = vld [vmem:[%s351_s21 + $0x4] sm:$0xf]  ;;  %v368_v5 = vld [vmem:[%s351_s21 + $0x8] sm:$0xf]  ;;  %s356_s10 = scalar_lea.vmem %s1663_s2, %s1506_s18 }
  0x1a   : > { %v379_v3 = vsel %vm374_vm1, %v366_v1, 0  ;;  %v425_v4 = vsel %vm374_vm1, %v367_v2, 0  ;;  %v369_v6 = vld [vmem:[%s351_s21 + $0xc] sm:$0xf]  ;;  %v362_v7 = vld [vmem:[%s346_s24] sm:$0xf] }
  0x1b   : > { %1205 = vmatpush3.bf16.xpose.msra.mxu0 %v379_v3  ;;  %1211 = vmatpush3.bf16.xpose.msra.mxu1 %v425_v4  ;;  %v363_v8 = vld [vmem:[%s346_s24 + $0x4] sm:$0xf]  ;;  %v471_v9 = vsel %vm374_vm1, %v368_v5, 0  ;;  %v517_v10 = vsel %vm374_vm1, %v369_v6, 0  ;;  %v364_v11 = vld [vmem:[%s346_s24 + $0x8] sm:$0xf] }
  0x1c   : > { %1216 = vmatprep.subr.bf16.mxu0 %v1399_v0  ;;  %1222 = vmatprep.subr.bf16.mxu1 %v1399_v0  ;;  %v365_v12 = vld [vmem:[%s346_s24 + $0xc] sm:$0xf]  ;;  %v370_v57 = vld [vmem:[%s356_s10] sm:$0xf]  ;;  %v371_v59 = vld [vmem:[%s356_s10 + $0x4] sm:$0xf] }
  0x1d   : > { %v616_v58 = vsel %vm614_vm2, %v370_v57, 0  ;;  %v662_v60 = vsel %vm614_vm2, %v371_v59, 0  ;;  %v372_v2 = vld [vmem:[%s356_s10 + $0x8] sm:$0xf]  ;;  %s1157_s24 = sshll.u32 %s1499_s17, 3  ;;  %s339_s17 = sand.u32 1, %s1389_s28  }
  0x1e   : > { %v708_v6 = vsel %vm614_vm2, %v372_v2, 0  ;;  %s1150_s18 = sshll.u32 %s339_s17, 3  ;;  %s1038_s13 = scalar_lea.sflag [#allocation3], %s339_s17 }
  0x22   : > { %1207 = vmatmul.mubr.msk.bf16.vlgmr.msra.gmra.mrb[0].mxu0 %vm374_vm1, %v362_v7  ;;  %1213 = vmatmul.mubr.msk.bf16.vlgmr.msra.gmra.mrb[0].mxu1 %vm374_vm1, %v363_v8  ;;  %v373_v8 = vld [vmem:[%s356_s10 + $0xc] sm:$0xf]  ;;  %s360_s10 = scalar_lea.vmem %s1664_s3, %s1157_s24  ;;  %s341_s24 = scalar_lea.vmem [#allocation2], %s1150_s18 }
  0x23   : > { %1217 = vmatpush3.bf16.xpose.msra.mxu0 %v471_v9  ;;  %1223 = vmatpush3.bf16.xpose.msra.mxu1 %v517_v10  ;;  %s1051_s25 = sshll.u32 %s341_s24, 4  ;;  %s1339_s18 = sshll.u32 %s1401_s9, 4  ;;  %s1620_s25 = int_to_ptr.vmem [resolvable:$true] %s1051_s25  ;;  %s1340_s18 = int_to_ptr.vmem [resolvable:$false] %s1339_s18 }
  0x24   : > { %1218 = vmatprep.mubr.msk.bf16.mxu0 %vm1400_vm0, %v1399_v0  ;;  %1224 = vmatprep.mubr.msk.bf16.mxu1 %vm1400_vm0, %v1399_v0  ;;  %s1335_s19 = scalar_lea.vmem %s1620_s25, 128  ;;  %s1341_s20 = scalar_lea.vmem %s1340_s18, 256 }
  0x25   : > { %1228 = vmatprep.subr.bf16.mxu0 %v1399_v0  ;;  %1234 = vmatprep.subr.bf16.mxu1 %v1399_v0  ;;  %p1336_p11 = scmp.ne.s32.totalorder %s1620_s25, %s1335_s19  ;;  %p1342_p0 = scmp.lt.s32.totalorder %s1620_s25, %s1340_s18 }
  0x26   : > { %p1343_p1 = scmp.lt.s32.totalorder %s1341_s20, %s1335_s19 }
  0x27   : > { %p1337_p12 = pnand %p1336_p11, %p1485_p5 }
  0x28   : > { %p1344_p2 = por %p1343_p1, %p1342_p0 }
  0x29   : > { %p1338_p13 = pneg %p1337_p12 }
  0x2a   : > { %1219 = vmatmul.mubr.msk.bf16.vlgmr.msra.gmra.mrb[4].mxu0 %vm374_vm1, %v364_v11  ;;  %1225 = vmatmul.mubr.msk.bf16.vlgmr.msra.gmra.mrb[4].mxu1 %vm374_vm1, %v365_v12  ;;  %v754_v11 = vsel %vm614_vm2, %v373_v8, 0 }
  0x2b   : > { %1230 = vmatprep.mubr.msk.bf16.mxu0 %vm1400_vm0, %v1399_v0  ;;  %1236 = vmatprep.mubr.msk.bf16.mxu1 %vm1400_vm0, %v1399_v0  ;;  %p1345_p3 = pnand %p1344_p2, %p1338_p13 }
  0x2c   : > { %1229 = vmatpush3.bf16.msra.mxu0 %v616_v58  ;;  %1235 = vmatpush3.bf16.msra.mxu1 %v662_v60 }
  0x2d   : > { %1240 = vmatprep.subr.bf16.mxu0 %v1399_v0  ;;  %1246 = vmatprep.subr.bf16.mxu1 %v1399_v0 }
  0xf5   : > { %v415_v13 = vpop.f32.mrb[0].mxu0  ;;  %v461_v14 = vpop.f32.mrb[0].mxu1 }
  0xf6   : > { %v559_v15 = vmul.f32 0.35355338, %v415_v13  ;;  %v1208_v16 = vpop.f32.mrb[1].mxu0  ;;  %v560_v17 = vmul.f32 0.35355338, %v461_v14  ;;  %v1214_v18 = vpop.f32.mrb[1].mxu1 }
  0xf7   : > { %v418_v19 = vpop.f32.mrb[2].mxu0  ;;  %v464_v20 = vpop.f32.mrb[2].mxu1  ;;  %v800_v13 = vld [vmem:[%s1665_s4] sm:$0xf] }
  0xf8   : > { %v1209_v21 = vpop.f32.mrb[3].mxu0  ;;  %v563_v22 = vsel %vm374_vm1, %v559_v15, -inf  ;;  %v1215_v23 = vpop.f32.mrb[3].mxu1  ;;  %v566_v24 = vsel %vm374_vm1, %v560_v17, -inf  ;;  %v808_v16 = vsel %vm614_vm2, %v800_v13, 0 }
  0xf9   : > { %564 = vmax.xlane.f32.xlu0 %v563_v22  ;;  %v801_v20 = vld [vmem:[%s1665_s4 + $0x4] sm:$0xf]  ;;  %v802_v22 = vld [vmem:[%s1665_s4 + $0x8] sm:$0xf] }
  0xfa   : > { %v854_v21 = vsel %vm614_vm2, %v801_v20, 0 }
  0xfd   : > { %567 = vmax.xlane.f32.xlu0 %v566_v24  ;;  %v507_v25 = vpop.f32.mrb[4].mxu0  ;;  %v553_v26 = vpop.f32.mrb[4].mxu1 }
  0xfe   : > { %v561_v27 = vmul.f32 0.35355338, %v507_v25  ;;  %v1220_v28 = vpop.f32.mrb[5].mxu0  ;;  %v562_v29 = vmul.f32 0.35355338, %v553_v26  ;;  %v1226_v30 = vpop.f32.mrb[5].mxu1 }
  0xff   : > { %v510_v31 = vpop.f32.mrb[6].mxu0  ;;  %v556_v32 = vpop.f32.mrb[6].mxu1  ;;  %v900_v26 = vsel %vm614_vm2, %v802_v22, 0  ;;  %v803_v28 = vld [vmem:[%s1665_s4 + $0xc] sm:$0xf] }
 0x100   : > { %v1221_v33 = vpop.f32.mrb[7].mxu0  ;;  %v569_v34 = vsel %vm374_vm1, %v561_v27, -inf  ;;  %v1227_v35 = vpop.f32.mrb[7].mxu1  ;;  %v572_v36 = vsel %vm374_vm1, %v562_v29, -inf }
 0x101   : > { %570 = vmax.xlane.f32.xlu1 %v569_v34  ;;  %v946_v33 = vsel %vm614_vm2, %v803_v28, 0 }
 0x105   : > { %573 = vmax.xlane.f32.xlu1 %v572_v36 }
 0x186   : > { %v565_v37 = vpop.xlane.xlu0 %564 }
 0x187   : > { %v575_v38 = vsub.f32 %v559_v15, %v565_v37 }
 0x189   : > { %v579_v39 = vmul.f32 1.442695, %v575_v38 }
 0x18a   : > { %v568_v40 = vpop.xlane.xlu0 %567 }
 0x18b   : > { %1317 = vpow2.f32 %v579_v39  ;;  %v576_v41 = vsub.f32 %v560_v17, %v568_v40 }
 0x18d   : > { %v581_v42 = vmul.f32 1.442695, %v576_v41 }
 0x18e   : > { %v571_v43 = vpop.xlane.xlu1 %570 }
 0x18f   : > { %1319 = vpow2.f32 %v581_v42  ;;  %v577_v44 = vsub.f32 %v561_v27, %v571_v43 }
 0x191   : > { %v583_v45 = vmul.f32 1.442695, %v577_v44 }
 0x192   : > { %v574_v46 = vpop.xlane.xlu1 %573 }
 0x193   : > { %1321 = vpow2.f32 %v583_v45  ;;  %v578_v47 = vsub.f32 %v562_v29, %v574_v46 }
 0x195   : > { %v1318_v48 = vpop.eup %1317  ;;  %v585_v49 = vmul.f32 1.442695, %v578_v47 }
 0x196   : > { %v587_v50 = vsel %vm374_vm1, %v1318_v48, 0.0 }
 0x197   : > { %1323 = vpow2.f32 %v585_v49  ;;  %588 = vadd.xlane.f32.xlu0 %v587_v50 }
 0x199   : > { %v1320_v51 = vpop.eup %1319 }
 0x19a   : > { %v590_v52 = vsel %vm374_vm1, %v1320_v51, 0.0 }
 0x19b   : > { %591 = vadd.xlane.f32.xlu1 %v590_v52 }
 0x19d   : > { %v1322_v53 = vpop.eup %1321 }
 0x19e   : > { %v593_v54 = vsel %vm374_vm1, %v1322_v53, 0.0 }
 0x19f   : > { %594 = vadd.xlane.f32.xlu0 %v593_v54 }
 0x1a1   : > { %v1324_v55 = vpop.eup %1323 }
 0x1a2   : > { %v596_v56 = vsel %vm374_vm1, %v1324_v55, 0.0 }
 0x1a3   : > { %597 = vadd.xlane.f32.xlu1 %v596_v56 }
 0x224   : > { %v589_v61 = vpop.xlane.xlu0 %588 }
 0x225   : > { %1325 = vrcp.f32 %v589_v61 }
 0x228   : > { %v592_v62 = vpop.xlane.xlu1 %591 }
 0x229   : > { %1327 = vrcp.f32 %v592_v62 }
 0x22c   : > { %v595_v63 = vpop.xlane.xlu0 %594 }
 0x22d   : > { %1329 = vrcp.f32 %v595_v63 }
 0x22f   : > { %v1326_v1 = vpop.eup %1325 }
 0x230   : > { %v603_v3 = vmul.f32 %v1326_v1, %v1318_v48  ;;  %v598_v4 = vpop.xlane.xlu1 %597  ;;  %v1170_v1 = vld [vmem:[%s1666_s5] ss:$0 sm:$0xff] }
 0x231   : > { %1331 = vrcp.f32 %v598_v4 }
 0x232   : > { %v607_v5 = vpack.c.bf16 %v603_v3, %v603_v3 }
 0x233   : > { %v1328_v7 = vpop.eup %1327 }
 0x234   : > { %v604_v9 = vmul.f32 %v1328_v7, %v1320_v51  ;;  %1231 = vmatmul.mubr.msk.bf16.vlgmr.msra.gmra.mrb[8].mxu0 %vm374_vm1, %v607_v5 }
 0x235   : > { %1241 = vmatpush3.bf16.msra.mxu0 %v708_v6  ;;  %1242 = vmatprep.mubr.msk.bf16.mxu0 %vm1400_vm0, %v1399_v0  ;;  %v1004_v6 = vld [vmem:[%s360_s10] sm:$0xff] }
 0x236   : > { %v608_v10 = vpack.c.bf16 %v604_v9, %v604_v9  ;;  %1252 = vmatprep.subr.bf16.mxu0 %v1399_v0 }
 0x237   : > { %v1330_v12 = vpop.eup %1329 }
 0x238   : > { %v605_v14 = vmul.f32 %v1330_v12, %v1322_v53  ;;  %1237 = vmatmul.mubr.msk.bf16.vlgmr.msra.gmra.mrb[8].mxu1 %vm374_vm1, %v608_v10 }
 0x239   : > { %1247 = vmatpush3.bf16.msra.mxu1 %v754_v11  ;;  %1248 = vmatprep.mubr.msk.bf16.mxu1 %vm1400_vm0, %v1399_v0 }
 0x23a   : > { %v609_v15 = vpack.c.bf16 %v605_v14, %v605_v14  ;;  %1258 = vmatprep.subr.bf16.mxu1 %v1399_v0 }
 0x23b   : > { %v1332_v17 = vpop.eup %1331 }
 0x23c   : > { %v606_v18 = vmul.f32 %v1332_v17, %v1324_v55  ;;  %1243 = vmatmul.mubr.msk.bf16.vlgmr.msra.gmra.mrb[12].mxu0 %vm374_vm1, %v609_v15 }
 0x23d   : > { %1253 = vmatpush3.bf16.msra.mxu0 %v808_v16  ;;  %1254 = vmatprep.mubr.msk.bf16.mxu0 %vm1400_vm0, %v1399_v0 }
 0x23e   : > { %v610_v19 = vpack.c.bf16 %v606_v18, %v606_v18  ;;  %1264 = vmatprep.subr.bf16.mxu0 %v1399_v0 }
 0x240   : > { %1249 = vmatmul.mubr.msk.bf16.vlgmr.msra.gmra.mrb[12].mxu1 %vm374_vm1, %v610_v19  ;;  %v1171_v19 = vld [vmem:[%s1667_s6] ss:$0 sm:$0xff] }
 0x241   : > { %1260 = vmatprep.mubr.msk.bf16.mxu1 %vm1400_vm0, %v1399_v0  ;;  %1259 = vmatpush3.bf16.msra.mxu1 %v854_v21  ;;  %v1172_v21 = vld [vmem:[%s1668_s7] ss:$0 sm:$0xff] }
 0x242   : > { %1270 = vmatprep.subr.bf16.mxu1 %v1399_v0 }
 0x307   : > { %v652_v23 = vpop.f32.mrb[8].mxu0 }
 0x308   : > { %v796_v24 = vpack.c.bf16 %v652_v23, %v652_v23  ;;  %v1232_v25 = vpop.f32.mrb[9].mxu0 }
 0x309   : > { %v655_v27 = vpop.f32.mrb[10].mxu0 }
 0x30a   : > { %v1233_v29 = vpop.f32.mrb[11].mxu0  ;;  %1255 = vmatmul.mubr.msk.bf16.vlgmr.msra.gmra.mrb[16].mxu0 %vm374_vm1, %v796_v24 }
 0x30b   : > { %v698_v30 = vpop.f32.mrb[8].mxu1  ;;  %1265 = vmatpush3.bf16.msra.mxu0 %v900_v26  ;;  %1266 = vmatprep.mubr.msk.bf16.mxu0 %vm1400_vm0, %v1399_v0 }
 0x30c   : > { %v797_v31 = vpack.c.bf16 %v698_v30, %v698_v30  ;;  %v1238_v32 = vpop.f32.mrb[9].mxu1 }
 0x30d   : > { %v701_v34 = vpop.f32.mrb[10].mxu1 }
 0x30e   : > { %v1239_v35 = vpop.f32.mrb[11].mxu1  ;;  %1261 = vmatmul.mubr.msk.bf16.vlgmr.msra.gmra.mrb[16].mxu1 %vm374_vm1, %v797_v31 }
 0x30f   : > { %v744_v36 = vpop.f32.mrb[12].mxu0  ;;  %1271 = vmatpush3.bf16.msra.mxu1 %v946_v33  ;;  %1272 = vmatprep.mubr.msk.bf16.mxu1 %vm1400_vm0, %v1399_v0 }
 0x310   : > { %v798_v37 = vpack.c.bf16 %v744_v36, %v744_v36  ;;  %v1244_v38 = vpop.f32.mrb[13].mxu0 }
 0x311   : > { %v747_v39 = vpop.f32.mrb[14].mxu0 }
 0x312   : > { %v1245_v40 = vpop.f32.mrb[15].mxu0  ;;  %1267 = vmatmul.mubr.msk.bf16.vlgmr.msra.gmra.mrb[20].mxu0 %vm374_vm1, %v798_v37 }
 0x313   : > { %v790_v41 = vpop.f32.mrb[12].mxu1 }
 0x314   : > { %v799_v42 = vpack.c.bf16 %v790_v41, %v790_v41  ;;  %v1250_v43 = vpop.f32.mrb[13].mxu1 }
 0x315   : > { %v793_v44 = vpop.f32.mrb[14].mxu1 }
 0x316   : > { %v1251_v45 = vpop.f32.mrb[15].mxu1  ;;  %1273 = vmatmul.mubr.msk.bf16.vlgmr.msra.gmra.mrb[20].mxu1 %vm374_vm1, %v799_v42 }
 0x3dd   : > { %v844_v46 = vpop.f32.mrb[16].mxu0 }
 0x3de   : > { %v1256_v47 = vpop.f32.mrb[17].mxu0  ;;  %v989_v50 = vsel %vm988_vm3, %v844_v46, 0.0 }
 0x3df   : > { %v847_v48 = vpop.f32.mrb[18].mxu0 }
 0x3e0   : > { %v1257_v49 = vpop.f32.mrb[19].mxu0 }
 0x3e1   : > { %v890_v0 = vpop.f32.mrb[16].mxu1 }
 0x3e2   : > { %v990_v51 = vsel %vm988_vm3, %v890_v0, 0.0  ;;  %v1262_v52 = vpop.f32.mrb[17].mxu1 }
 0x3e3   : > { %v991_v53 = vadd.f32 %v990_v51, %v989_v50  ;;  %v893_v54 = vpop.f32.mrb[18].mxu1 }
 0x3e4   : > { %v1263_v55 = vpop.f32.mrb[19].mxu1 }
 0x3e5   : > { %v936_v56 = vpop.f32.mrb[20].mxu0 }
 0x3e6   : > { %v992_v57 = vsel %vm988_vm3, %v936_v56, 0.0  ;;  %v1268_v58 = vpop.f32.mrb[21].mxu0 }
 0x3e7   : > { %v993_v59 = vadd.f32 %v992_v57, %v991_v53  ;;  %v939_v60 = vpop.f32.mrb[22].mxu0 }
 0x3e8   : > { %v1269_v61 = vpop.f32.mrb[23].mxu0 }
 0x3e9   : > { %v982_v62 = vpop.f32.mrb[20].mxu1 }
 0x3ea   : > { %v994_v63 = vsel %vm988_vm3, %v982_v62, 0.0  ;;  %v1274_v2 = vpop.f32.mrb[21].mxu1 }
 0x3eb   : > { %v995_v3 = vadd.f32 %v994_v63, %v993_v59  ;;  %v985_v4 = vpop.f32.mrb[22].mxu1 }
 0x3ec   : > { %v1275_v5 = vpop.f32.mrb[23].mxu1 }
 0x3ed   : > { %v1003_v7 = vadd.f32 %v1170_v1, %v995_v3 }
 0x3ef   : > { %v1005_v8 = vadd.f32 %v1004_v6, %v1003_v7 }
 0x3f1   : > { %v1006_v9 = vsel %vm988_vm3, %v1005_v8, 0.0 }
 0x3f2   : > { %1007 = vadd.xlane.f32.xlu0 %v1006_v9 }
 0x47f   : > { %v1008_v10 = vpop.xlane.xlu0 %1007 }
 0x480   : > { %v1010_v11 = vmul.f32 0.03125, %v1008_v10 }
 0x482   : > { %v1011_v12 = vsub.f32 %v1005_v8, %v1010_v11 }
 0x484   : > { %v1012_v13 = vmul.f32 %v1011_v12, %v1011_v12 }
 0x486   : > { %v1013_v14 = vsel %vm988_vm3, %v1012_v13, 0.0 }
 0x487   : > { %1014 = vadd.xlane.f32.xlu1 %v1013_v14 }
 0x514   : > { %v1015_v15 = vpop.xlane.xlu1 %1014 }
 0x515   : > { %v1016_v16 = vmul.f32 0.03125, %v1015_v15 }
 0x517   : > { %v1017_v17 = vadd.f32 1e-05, %v1016_v16 }
 0x519   : > { %1333 = vrsqrt.f32 %v1017_v17 }
 0x523   : > { %v1334_v18 = vpop.eup %1333 }
 0x524   : > { %v1019_v20 = vmul.f32 %v1334_v18, %v1011_v12 }
 0x526   : > { %v1027_v22 = vmul.f32 %v1171_v19, %v1019_v20 }
 0x528   : > { %v1035_v23 = vadd.f32 %v1172_v21, %v1027_v22 }
 0x52a   : > { %1036 = vst.msk [vmem:[%s341_s24] sm:$0xff] %vm988_vm3, %v1035_v23 }
 0x52b   : > { %1348 = shalt.err (!%p1345_p3)
}
 0x52c   : > { %s1349_s17 = scalar_lea.hbm %s1618_s12, 128  ;;  %s1353_s23 = scalar_lea.hbm %s1669_s8, 256 }
 0x52d   : > { %p1350_p4 = scmp.ne.s32.totalorder %s1618_s12, %s1349_s17  ;;  %p1354_p9 = scmp.lt.u32.totalorder %s1618_s12, %s1669_s8 }
 0x52e   : > { %p1355_p10 = scmp.lt.u32.totalorder %s1353_s23, %s1349_s17  ;;  %p1357_p12 = scmp.lt.u32.totalorder %s1349_s17, %s1618_s12 }
 0x52f   : > { %p1351_p7 = pnand %p1350_p4, %p1485_p5 }
 0x530   : > { %p1356_p11 = por %p1355_p10, %p1354_p9 }
 0x531   : > { %p1352_p8 = pneg %p1351_p7 }
 0x532   : > { %p1358_p13 = por %p1357_p12, %p1356_p11 }
 0x534   : > { %p1359_p0 = pnand %p1358_p13, %p1352_p8 }
 0x536   : > { %1362 = shalt.err (!%p1359_p0)
}
 0x537   : > { %1276 = dma.vmem_to_hbm [thread:$0]  (%p1485_p5), %s1620_s25, 128, %s1618_s12, %s1038_s13  }
 0x538 PF: > { %p1282_p1 = scmp.ge.s32.totalorder %s1397_s30, 2  ;;  %s1063_s10 = sand.u32 1, %s1385_s27  }
 0x539   : > { %s1064_s19 = scalar_lea.sflag [#allocation3], %s1063_s10 }
 0x53a   : > { %p1279_p2 = pnand %p1282_p1, %p1489_p6 }
 0x53c   : > { %1380 = dma.done.wait (!%p1279_p2), %s1064_s19, 128  }
 0x53d   : > { %1382 = vsyncadd (!%p1279_p2), %s1064_s19, 4294967168  ;;  %p18_p3 = scmp.ge.s32.totalorder %s1472_s11, 4   ;;  %s1672_s27 = smov %s1389_s28 }
 0x53e   : > { %s1673_s28 = smov %s1393_s29  ;;  %s1674_s29 = smov %s1483_s14 }
 0x53f   : > { %s1675_s30 = smov %s1472_s11  ;;  %20 = sbr.rel (!%p18_p3) target bundleno = 3 (0x3), region = 96 }
 0x546   :  { %1069 = vsyncpa [#allocation3], 1 }
 0x547   :  { %1071 = vsyncpa [#allocation3 + $0x1], 1 }

</bundles_post_ra>
